<compile_context>
chip_gen: v5e
topology: v5e:2x2
jax: 0.10.0
libtpu: 0.0.40
codegen_flags: <defaults>
</compile_context>

<pallas_src>
import functools

import jax
import jax.numpy as jnp
from jax.experimental import pallas as pl
from jax.experimental.pallas import tpu as pltpu


# ---------------------------------------------------------------------------
# Kernels 1 & 3: tiled linear  y = x @ W + b   (QKV projection, output proj)
# ---------------------------------------------------------------------------
def _linear_kernel(x_ref, w_ref, b_ref, o_ref):
    """x_ref (1, T, Din), w_ref (Din, Dout), b_ref (1, Dout), o_ref (1, T, Dout)."""
    y = jnp.dot(x_ref[0], w_ref[...], preferred_element_type=jnp.float32)
    o_ref[0] = (y + b_ref[...]).astype(o_ref.dtype)


def _linear(x, w, b, *, tile):
    """(B, S, Din) @ (Din, Dout) + (1, Dout) -> (B, S, Dout), in x.dtype."""
    B, S, Din = x.shape
    Dout = w.shape[1]
    assert S % tile == 0
    return pl.pallas_call(
        _linear_kernel,
        out_shape=jax.ShapeDtypeStruct((B, S, Dout), x.dtype),
        grid_spec=pltpu.PrefetchScalarGridSpec(
            num_scalar_prefetch=0,
            grid=(B, S // tile),
            in_specs=[
                pl.BlockSpec((1, tile, Din), lambda b, i: (b, i, 0)),
                pl.BlockSpec((Din, Dout), lambda b, i: (0, 0)),
                pl.BlockSpec((1, Dout), lambda b, i: (0, 0)),
            ],
            out_specs=pl.BlockSpec((1, tile, Dout), lambda b, i: (b, i, 0)),
        ),
        compiler_params=pltpu.CompilerParams(
            dimension_semantics=("parallel", "parallel")),
    )(x, w, b)


# ---------------------------------------------------------------------------
# Kernel 2: flash attention over pre-projected, head-major q/k/v
# ---------------------------------------------------------------------------
def _flash_kernel(q_ref, k_ref, v_ref, o_ref, m_scr, l_scr, acc_scr,
                  *, seq_len: int, tile_k: int, needs_mask: bool):
    """Grid = (B, heads, q_tiles, kv_tiles); KV axis is the online-softmax
    reduction.

    q_ref        : (1, 1, tile_q, d)  input dtype
    k_ref, v_ref : (1, 1, tile_k, d)  input dtype
    o_ref        : (1, 1, tile_q, d)  written at the last KV step
    m_scr, l_scr : (tile_q, 1) f32    acc_scr : (tile_q, d) f32
    """
    kj = pl.program_id(3)

    @pl.when(kj == 0)
    def _init():
        m_scr[...] = jnp.full_like(m_scr, -jnp.inf)
        l_scr[...] = jnp.zeros_like(l_scr)
        acc_scr[...] = jnp.zeros_like(acc_scr)

    q = q_ref[0, 0]                                              # (tq, d)
    k = k_ref[0, 0]                                              # (tk, d)
    v = v_ref[0, 0]                                              # (tk, d)

    # Softmax scale is already folded into the Q projection weights.
    s = jnp.einsum('qd,kd->qk', q, k,
                   preferred_element_type=jnp.float32)           # (tq, tk) f32

    if needs_mask:  # static flag: sequence was padded up to a tile multiple
        col = jax.lax.broadcasted_iota(jnp.int32, s.shape, 1) + kj * tile_k
        s = jnp.where(col < seq_len, s, -1e30)

    m_prev = m_scr[...]
    m_new = jnp.maximum(m_prev, jnp.max(s, axis=-1, keepdims=True))
    alpha = jnp.exp(m_prev - m_new)
    p = jnp.exp(s - m_new)                                       # (tq, tk)
    l_scr[...] = alpha * l_scr[...] + jnp.sum(p, axis=-1, keepdims=True)

    # Reference casts softmax probs back to the input dtype before p @ v
    # (`.type_as(q)`); skip the round-trip entirely for float32 inputs.
    if o_ref.dtype != jnp.float32:
        p = p.astype(o_ref.dtype)

    acc_scr[...] = alpha * acc_scr[...] + jnp.dot(
        p, v, preferred_element_type=jnp.float32)
    m_scr[...] = m_new

    @pl.when(kj == pl.num_programs(3) - 1)
    def _finalize():
        o_ref[0, 0] = (acc_scr[...] / l_scr[...]).astype(o_ref.dtype)


def _flash_attention(q, k, v, *, seq_len, tile_q, tile_k):
    """q/k/v: (B, heads, S_pad, d)  ->  (B, heads, S_pad, d) in q.dtype."""
    B, nh, s_pad, d = q.shape
    needs_mask = s_pad != seq_len
    kernel = functools.partial(_flash_kernel, seq_len=seq_len,
                               tile_k=tile_k, needs_mask=needs_mask)
    return pl.pallas_call(
        kernel,
        out_shape=jax.ShapeDtypeStruct((B, nh, s_pad, d), q.dtype),
        grid_spec=pltpu.PrefetchScalarGridSpec(
            num_scalar_prefetch=0,
            grid=(B, nh, s_pad // tile_q, s_pad // tile_k),
            in_specs=[
                pl.BlockSpec((1, 1, tile_q, d), lambda b, h, qi, kj: (b, h, qi, 0)),
                pl.BlockSpec((1, 1, tile_k, d), lambda b, h, qi, kj: (b, h, kj, 0)),
                pl.BlockSpec((1, 1, tile_k, d), lambda b, h, qi, kj: (b, h, kj, 0)),
            ],
            out_specs=pl.BlockSpec((1, 1, tile_q, d),
                                   lambda b, h, qi, kj: (b, h, qi, 0)),
            scratch_shapes=[
                pltpu.VMEM((tile_q, 1), jnp.float32),   # running max
                pltpu.VMEM((tile_q, 1), jnp.float32),   # running sum
                pltpu.VMEM((tile_q, d), jnp.float32),   # output accumulator
            ],
        ),
        compiler_params=pltpu.CompilerParams(
            dimension_semantics=("parallel", "parallel", "parallel", "arbitrary")),
        cost_estimate=pl.CostEstimate(
            flops=int(4 * B * nh * s_pad * s_pad * d),
            transcendentals=int(B * nh * s_pad * s_pad),
            bytes_accessed=int(q.dtype.itemsize * 4 * B * nh * s_pad * d)),
    )(q, k, v)


# ---------------------------------------------------------------------------
# Tiling helper + top-level wrapper
# ---------------------------------------------------------------------------
def _round_up(x: int, m: int) -> int:
    return (x + m - 1) // m * m


def _pick_seq_tiling(seq_len: int):
    """Return (padded_seq_len, tile). Small sequences use one sublane-aligned
    tile; long sequences use lane/MXU-friendly tiles (multiples of 128) and the
    sequence is padded (and masked in-kernel) rather than falling back to a
    full-sequence tile."""
    if seq_len <= 512:
        t = _round_up(seq_len, 8)
        return t, t
    for t in (512, 384, 256, 128):
        if seq_len % t == 0:
            return seq_len, t
    return _round_up(seq_len, 128), 128


def multi_head_attention(x, wq, wk, wv, wp, bp, *, num_heads: int):
    """x: (B, S, D); wq/wk/wv: (D, H) stored as (in, out); wp: (H, H); bp: (H,).

    Matches MultiHeadAttention.forward(x) in eval mode (self-attention,
    qkv_bias=False, no rope/rpr/masks/dropout). Returns (B, S, H).
    """
    B, S, D = x.shape
    H = wq.shape[1]
    assert H % num_heads == 0
    head_dim = H // num_heads
    scale = head_dim ** (-0.5)

    s_pad, tile = _pick_seq_tiling(S)
    if s_pad != S:
        x = jnp.pad(x, ((0, 0), (0, s_pad - S), (0, 0)))

    dt = x.dtype
    # Wrapper-side weight plumbing (one-time, no per-step cost): fuse Q/K/V into
    # one (D, 3H) matmul and fold the softmax scale into the Q columns.
    wqkv = jnp.concatenate([wq * scale, wk, wv], axis=1).astype(dt)   # (D, 3H)
    zero_bias = jnp.zeros((1, 3 * H), dtype=dt)                       # qkv_bias=False

    # 1) fused QKV projection (single wide, lane-dense MXU matmul per tile).
    qkv = _linear(x, wqkv, zero_bias, tile=tile)                      # (B, s_pad, 3H)

    # Head split is wrapper-side layout plumbing (XLA transpose on HBM); the
    # attention kernel then sees head-major (B, h, S, d) blocks directly.
    qkv = qkv.reshape(B, s_pad, 3, num_heads, head_dim)
    qkv = jnp.transpose(qkv, (2, 0, 3, 1, 4))                         # (3, B, h, s_pad, d)
    q, k, v = qkv[0], qkv[1], qkv[2]

    # 2) flash attention: online softmax over the KV grid axis, f32 accumulators.
    o = _flash_attention(q, k, v, seq_len=S, tile_q=tile, tile_k=tile)

    # 3) merge heads, then a single (S, H) @ (H, H) output projection + bias.
    o = jnp.transpose(o, (0, 2, 1, 3)).reshape(B, s_pad, H)
    out = _linear(o, wp.astype(dt), bp.reshape(1, H).astype(dt), tile=tile)
    return out[:, :S, :]


# ---------------------------------------------------------------------------
# Pure-JAX reference mirroring the PyTorch forward (eval, self-attention)
# ---------------------------------------------------------------------------
def _reference(x, wq, wk, wv, wp, bp, *, num_heads: int):
    B, S, D = x.shape
    H = wq.shape[1]
    hd = H // num_heads
    scale = hd ** (-0.5)
    q = x @ wq
    k = x @ wk
    v = x @ wv
    q = q.reshape(B, S, num_heads, hd).transpose(0, 2, 1, 3)
    k = k.reshape(B, S, num_heads, hd).transpose(0, 2, 1, 3)
    v = v.reshape(B, S, num_heads, hd).transpose(0, 2, 1, 3)
    s = jnp.einsum('bhid,bhjd->bhij', q, k)
    p = jax.nn.softmax((s * scale).astype(jnp.float32), axis=-1).astype(x.dtype)
    o = jnp.einsum('bhij,bhjd->bhid', p, v)
    o = o.transpose(0, 2, 1, 3).reshape(B, S, H)
    return o @ wp + bp


if __name__ == "__main__":
    def xavier(key, fan_in, fan_out, dtype):
        bound = (6.0 / (fan_in + fan_out)) ** 0.5
        return jax.random.uniform(key, (fan_in, fan_out), jnp.float32,
                                  -bound, bound).astype(dtype)

    def run_case(seed, B, S, D, H, num_heads, dtype, atol, rtol):
        key = jax.random.PRNGKey(seed)
        kx, kq, kk, kv, kp, kb = jax.random.split(key, 6)
        x = jax.random.normal(kx, (B, S, D), jnp.float32).astype(dtype)
        wq = xavier(kq, D, H, dtype)
        wk = xavier(kk, D, H, dtype)
        wv = xavier(kv, D, H, dtype)
        wp = xavier(kp, H, H, dtype)
        bound = 1.0 / (H ** 0.5)
        bp = jax.random.uniform(kb, (H,), jnp.float32, -bound, bound).astype(dtype)

        out = multi_head_attention(x, wq, wk, wv, wp, bp, num_heads=num_heads)
        out = jax.block_until_ready(out)
        ref = _reference(x, wq, wk, wv, wp, bp, num_heads=num_heads)

        assert out.shape == (B, S, H), out.shape
        out_f = out.astype(jnp.float32)
        ref_f = ref.astype(jnp.float32)
        err = float(jnp.max(jnp.abs(out_f - ref_f)))
        assert jnp.allclose(out_f, ref_f, atol=atol, rtol=rtol), \
            f"mismatch vs reference (max abs err {err})"

    # Small shapes consistent with the module's forward: (batch, seq, dim).
    run_case(0, B=2, S=8, D=32, H=32, num_heads=4, dtype=jnp.float32,
             atol=5e-3, rtol=5e-3)
    # Non-multiple-of-8 sequence: exercises padding + in-kernel KV masking.
    run_case(1, B=1, S=12, D=32, H=64, num_heads=4, dtype=jnp.float32,
             atol=5e-3, rtol=5e-3)
    # bf16 path: q/k/v tiles stay bf16 (full-rate MXU operands), accumulators f32.
    run_case(2, B=2, S=8, D=32, H=32, num_heads=2, dtype=jnp.bfloat16,
             atol=1e-1, rtol=1e-1)

    print("KERNEL_OK")
</pallas_src>

<mosaic_0001>
module attributes {stable_mosaic.version = 11 : i64} {
  func.func @_linear_kernel(%arg0: i32, %arg1: i32, %arg2: memref<1x8x32xf32, #tpu.memory_space<vmem>>, %arg3: memref<32x96xf32, #tpu.memory_space<vmem>>, %arg4: memref<1x96xf32, #tpu.memory_space<vmem>>, %arg5: memref<1x8x96xf32, #tpu.memory_space<vmem>>) attributes {dimension_semantics = [#tpu.dimension_semantics<parallel>, #tpu.dimension_semantics<parallel>], iteration_bounds = array<i64: 2, 1>, scalar_prefetch = 0 : i64, scratch_operands = 0 : i64, tpu.core_type = #tpu.core_type<tc>, window_params = [{transform_indices = @transform_0, window_bounds = array<i64: 1, 8, 32>}, {pipeline_mode = #tpu.pipeline_mode<synchronous>, transform_indices = @transform_1, window_bounds = array<i64: 32, 96>}, {pipeline_mode = #tpu.pipeline_mode<synchronous>, transform_indices = @transform_2, window_bounds = array<i64: 1, 96>}, {transform_indices = @transform_3, window_bounds = array<i64: 1, 8, 96>}]} {
    %c0 = arith.constant 0 : index
    %c0_0 = arith.constant 0 : index
    %c0_1 = arith.constant 0 : index
    %0 = vector.load %arg2[%c0, %c0_0, %c0_1] : memref<1x8x32xf32, #tpu.memory_space<vmem>>, vector<1x8x32xf32>
    %1 = vector.shape_cast %0 : vector<1x8x32xf32> to vector<8x32xf32>
    %c0_2 = arith.constant 0 : index
    %c0_3 = arith.constant 0 : index
    %2 = vector.load %arg3[%c0_2, %c0_3] : memref<32x96xf32, #tpu.memory_space<vmem>>, vector<32x96xf32>
    %cst = arith.constant dense<0.000000e+00> : vector<8x96xf32>
    %3 = tpu.matmul %1, %2, %cst {dimension_numbers = #tpu.dot_dimension_numbers<[1], [0], [0], [1], [0, 0, 1, 1], [], []>} : vector<8x32xf32>, vector<32x96xf32>, vector<8x96xf32> -> vector<8x96xf32>
    %c0_4 = arith.constant 0 : index
    %c0_5 = arith.constant 0 : index
    %4 = vector.load %arg4[%c0_4, %c0_5] : memref<1x96xf32, #tpu.memory_space<vmem>>, vector<1x96xf32>
    %5 = vector.broadcast %4 : vector<1x96xf32> to vector<8x96xf32>
    %6 = arith.addf %3, %5 : vector<8x96xf32>
    %c0_6 = arith.constant 0 : index
    %c0_7 = arith.constant 0 : index
    %c0_8 = arith.constant 0 : index
    %7 = vector.load %arg5[%c0_6, %c0_7, %c0_8] : memref<1x8x96xf32, #tpu.memory_space<vmem>>, vector<1x8x96xf32>
    %8 = vector.shape_cast %7 : vector<1x8x96xf32> to vector<8x96xf32>
    %9 = vector.shape_cast %6 : vector<8x96xf32> to vector<1x8x96xf32>
    tpu.vector_store %arg5[%c0_6, %c0_7, %c0_8], %9 {strides = array<i32>} : memref<1x8x96xf32, #tpu.memory_space<vmem>>, vector<1x8x96xf32>,
    return
  }
  func.func @transform_0(%arg0: i32, %arg1: i32) -> (i32, i32, i32) {
    %c0_i32 = arith.constant 0 : i32
    %c0_i32_0 = arith.constant 0 : i32
    return %arg0, %arg1, %c0_i32 : i32, i32, i32
  }
  func.func @transform_1(%arg0: i32, %arg1: i32) -> (i32, i32) {
    %c0_i32 = arith.constant 0 : i32
    %c0_i32_0 = arith.constant 0 : i32
    %c0_i32_1 = arith.constant 0 : i32
    return %c0_i32, %c0_i32_0 : i32, i32
  }
  func.func @transform_2(%arg0: i32, %arg1: i32) -> (i32, i32) {
    %c0_i32 = arith.constant 0 : i32
    %c0_i32_0 = arith.constant 0 : i32
    %c0_i32_1 = arith.constant 0 : i32
    return %c0_i32, %c0_i32_0 : i32, i32
  }
  func.func @transform_3(%arg0: i32, %arg1: i32) -> (i32, i32, i32) {
    %c0_i32 = arith.constant 0 : i32
    %c0_i32_0 = arith.constant 0 : i32
    return %arg0, %arg1, %c0_i32 : i32, i32, i32
  }
}

</mosaic_0001>

<bundles_post_ra>
// kernel: tpu_custom_call.1
= control target key start
LH: loop header
LB: loop body
LE: loop exit
PB: predicated region body
PF: predicated region fallthrough
CT: control target
= control target key end

     0   :  { %8 = vsyncpa [#allocation3], 0  ;;  %s773_s0 = inlined_call_operand.hbm [shape: f32[2,8,32], index: 0, kind: input, shape index: {}]   ;;  %s774_s1 = inlined_call_operand.hbm [shape: f32[32,96], index: 1, kind: input, shape index: {}]   ;;  %s775_s2 = inlined_call_operand.vmem [shape: f32[1,96], index: 2, kind: input, shape index: {}]   ;;  %s776_s3 = inlined_call_operand.hbm [shape: f32[2,8,96], index: 3, kind: output, shape index: {}]  }
   0x1   :  { %10 = vsyncpa [#allocation3 + $0x1], 0 }
   0x2   :  { %11 = vsyncpa [#allocation6], 0 }
   0x3   :  { %12 = vsyncpa [#allocation4], 0 }
   0x4   :  { %14 = vsyncpa [#allocation4 + $0x1], 0  ;;  %s627_s12 = smov 0   ;;  %s629_s13 = smov 0  }
   0x5   :  { %s631_s14 = smov 0   ;;  %s633_s15 = smov 0  }
   0x6   :  { %s635_s16 = smov 0   ;;  %s637_s17 = smov 0  }
   0x7 LB: > { %s364_s18 = sadd.s32 4294967295, %s602_s17   ;;  %p366_p0 = scmp.ge.s32.totalorder %s602_s17, 1  ;;  %s602_s17 = sphi %s637_s17, %s20_s17   ;;  %s598_s16 = sphi %s635_s16, %s787_s16   ;;  %s594_s15 = sphi %s633_s15, %s786_s15   ;;  %s590_s14 = sphi %s631_s14, %s785_s14   ;;  %s586_s13 = sphi %s629_s13, %s784_s13   ;;  %s582_s12 = sphi %s627_s12, %s783_s12  }
   0x8   : > { %p659_p1 = scmp.eq.s32.totalorder %s364_s18, 0  ;;  %p135_p2 = scmp.lt.s32.totalorder %s602_s17, 3 }
   0x9   : > { %s146_s22 = sshll.u32 %s774_s1, 4  ;;  %s604_s24 = smov [#allocation5]   ;;  %s147_s22 = int_to_ptr.hbm [resolvable:$true] %s146_s22 }
   0xa   : > { %p667_p3 = pnand %p366_p0, %p135_p2  ;;  %s148_s25 = sshll.u32 %s604_s24, 4  ;;  %s149_s25 = int_to_ptr.vmem [resolvable:$true] %s148_s25 }
   0xb   : > { %p368_p6 = scmp.ge.s32.totalorder %s602_s17, 2  ;;  %s605_s26 = smov 128  }
   0xc   : > { %p388_p4 = pneg %p667_p3  ;;  %s606_s27 = smov 8  }
   0xd   : > { %s365_s28 = sadd.s32 4294967294, %s602_s17   ;;  %s32_s29 = sadd.s32 1, %s598_s16 }
   0xe   : > { %p389_p5 = pnand %p388_p4, %p659_p1  ;;  %s41_s30 = sadd.s32 1, %s590_s14 }
   0xf   : > { %p34_p7 = scmp.ge.s32.totalorder %s32_s29, 2  ;;  %p48_p8 = scmp.ne.s32.totalorder %s590_s14, %s586_s13 }
  0x10   : > { %391 = dma.hbm_to_vmem [thread:$0]  (!%p389_p5), %s147_s22, 512, %s149_s25, [#allocation6], %s605_s26, %s605_s26, %s606_s27  }
  0x11   : > { %p49_p9 = scmp.eq.s32.totalorder %s602_s17, 0  ;;  %p54_p10 = scmp.ne.s32.totalorder %s586_s13, %s582_s12 }
  0x12   : > { %s789_s29 = smov (%p34_p7, %s32_s29), 0  ;;  %p122_p13 = scmp.eq.s32.totalorder %s364_s18, 1 }
  0x13   : > { %p686_p11 = por %p49_p9, %p48_p8  ;;  %p692_p12 = por %p659_p1, %p54_p10 }
  0x14   : > { %s36_s6 = ssub.s32 %s598_s16, %s789_s29  ;;  %p128_p2 = scmp.eq.s32.totalorder %s365_s28, 1 }
  0x15   : > { %p39_p0 = scmp.eq.s32.totalorder %s36_s6, 0  ;;  %p698_p4 = por %p122_p13, %p48_p8 }
  0x16   : > { %p401_p5 = scmp.lt.s32.totalorder %s602_s17, 2  ;;  %p706_p7 = por %p128_p2, %p54_p10 }
  0x17   : > { %s704_s8 = scalar_select %p39_p0, %s590_s14, %s41_s30  }
  0x18   : > { %s165_s10 = sand.u32 1, %s590_s14   ;;  %s370_s20 = sshll.u32 %s598_s16, 3 }
  0x19   : > { %s369_s11 = sshll.u32 %s165_s10, 3  ;;  %s174_s18 = scalar_lea.hbm %s773_s0, %s370_s20 }
  0x1a   : > { %s169_s24 = scalar_lea.vmem [#allocation2], %s369_s11  ;;  %s176_s26 = sshll.u32 %s174_s18, 4  ;;  %s177_s26 = int_to_ptr.hbm [resolvable:$true] %s176_s26 }
  0x1b   : > { %s178_s25 = sshll.u32 %s169_s24, 4  ;;  %p393_p8 = pnand %p401_p5, %p686_p11  ;;  %s179_s25 = int_to_ptr.vmem [resolvable:$true] %s178_s25 }
  0x1c   : > { %s166_s27 = scalar_lea.sflag [#allocation3], %s165_s10  ;;  %187 = sbr.rel (%p667_p3) target bundleno = 175 (0xaf), region = 32 }
  0x1d   : > { %395 = dma.hbm_to_vmem [thread:$0]  (!%p393_p8), %s177_s26, 128, %s179_s25, %s166_s27  }
  0x1e   : > { %s720_s28 = sand.u32 (!%p667_p3), 1, %s586_s13  }
  0x1f   : > { %s372_s30 = sshll.u32 (!%p667_p3), %s720_s28, 3  ;;  %s190_s6 = scalar_lea.sflag (!%p667_p3), [#allocation3], %s720_s28 }
  0x20   : > { %s193_s11 = scalar_lea.vmem (!%p667_p3), [#allocation2], %s372_s30 }
  0x21   : > { %569 = dma.done.wait (%p692_p12), %s190_s6, 128  }
  0x22   : > { %571 = vsyncadd (%p692_p12), %s190_s6, 4294967168 }
  0x23   : > { %573 = dma.done.wait (%p659_p1), [#allocation6], 512  }
  0x24   : > { %575 = vsyncadd (%p659_p1), [#allocation6], 4294966784  ;;  %v226_v0 = vld [vmem:[#allocation5 + $0x18] sm:$0xff]  ;;  %v225_v1 = vld [vmem:[#allocation5 + $0x10] sm:$0xff]  ;;  %vm231_vm0 = vcmask 261120   ;;  %s377_s23 = sshll.u32 %s594_s15, 3 }
  0x25   : > { %247 = vmatpush.msra.mxu0 %v226_v0  ;;  %v224_v2 = vld [vmem:[#allocation5 + $0x8] sm:$0xff]  ;;  %v223_v3 = vld [vmem:[#allocation5] sm:$0xff]  ;;  %v222_v4 = vld [vmem:[%s193_s11] sm:$0xff]  ;;  %s269_s10 = scalar_lea.hbm %s776_s3, %s377_s23  ;;  %s221_s21 = scalar_lea.vmem [#allocation7], %s372_s30  ;;  %vm255_vm1 = vcmask 785408  }
  0x26   : > { %v455_v5 = vld [vmem:[%s775_s2] ss:$0 sm:$0xff]  ;;  %s271_s22 = sshll.u32 %s221_s21, 4  ;;  %s273_s18 = sshll.u32 %s269_s10, 4  ;;  %s272_s22 = int_to_ptr.vmem [resolvable:$true] %s271_s22  ;;  %s274_s18 = int_to_ptr.hbm [resolvable:$true] %s273_s18 }
  0x27   : > { %248 = vmatpush.msra.mxu0 %v225_v1  ;;  %s258_s24 = scalar_lea.sflag [#allocation4], %s720_s28  ;;  %s530_s15 = sshra.s32 %s274_s18, 4  ;;  %s531_s15 = int_to_ptr.hbm [resolvable:$true] %s530_s15 }
  0x28   : > { %s532_s25 = scalar_lea.hbm %s531_s15, 8  ;;  %s536_s30 = scalar_lea.hbm %s776_s3, 16 }
  0x29   : > { %249 = vmatpush.msra.mxu0 %v224_v2  ;;  %p533_p1 = scmp.ne.s32.totalorder %s531_s15, %s532_s25  ;;  %p537_p10 = scmp.lt.s32.totalorder %s531_s15, %s776_s3 }
  0x2a   : > { %p538_p11 = scmp.lt.s32.totalorder %s536_s30, %s532_s25 }
  0x2b   : > { %250 = vmatpush.msra.mxu0 %v223_v3  ;;  %p534_p3 = pnand %p533_p1, %p698_p4 }
  0x2c   : > { %375 = vmatmul.msk.f32.vlgmr.msra.gmra.mxu0 %vm231_vm0, %v222_v4  ;;  %p539_p12 = por %p538_p11, %p537_p10 }
  0x2d   : > { %p535_p9 = pneg %p534_p3 }
  0x2f   : > { %p540_p13 = pnand %p539_p12, %p535_p9 }
  0xa9   : > { %v252_v6 = vpop.f32.mrf.mxu0 }
  0xaa   : > { %v253_v7 = vadd.f32 %v455_v5, %v252_v6 }
  0xac   : > { %256 = vst.msk [vmem:[%s221_s21] sm:$0xff] %vm255_vm1, %v253_v7 }
  0xad   : > { %543 = shalt.err (!%p540_p13)
}
  0xae   : > { %386 = dma.vmem_to_hbm [thread:$0]  (%p698_p4), %s272_s22, 128, %s274_s18, %s258_s24  }
  0xaf PF: > { %s285_s28 = sand.u32 1, %s582_s12   ;;  %p397_p0 = pnand %p368_p6, %p706_p7 }
  0xb0   : > { %s286_s23 = scalar_lea.sflag [#allocation4], %s285_s28 }
  0xb1   : > { %p398_p2 = pneg %p397_p0 }
  0xb3   : > { %577 = dma.done.wait (%p398_p2), %s286_s23, 128  }
  0xb4   : > { %579 = vsyncadd (%p398_p2), %s286_s23, 4294967168  ;;  %s20_s17 = sadd.s32 1, %s602_s17   ;;  %s783_s12 = smov %s586_s13 }
  0xb5   : > { %p17_p5 = scmp.ge.s32.totalorder %s20_s17, 4   ;;  %s784_s13 = smov %s590_s14 }
  0xb6   : > { %s785_s14 = smov %s704_s8  ;;  %s786_s15 = smov %s598_s16 }
  0xb7   : > { %s787_s16 = smov %s789_s29  ;;  %19 = sbr.rel (!%p17_p5) target bundleno = 7 (0x7), region = 81 }
  0xbc   :  { %292 = vsyncpa [#allocation3], 1 }
  0xbd   :  { %294 = vsyncpa [#allocation3 + $0x1], 1 }
  0xbe   :  { %295 = vsyncpa [#allocation6], 1 }
  0xbf   :  { %296 = vsyncpa [#allocation4], 1 }
  0xc0   :  { %298 = vsyncpa [#allocation4 + $0x1], 1 }

</bundles_post_ra>
